<compile_context>
chip_gen: v5e
topology: v5e:2x2
jax: 0.10.0
libtpu: 0.0.40
codegen_flags: <defaults>
</compile_context>

<pallas_src>
import math
from collections import OrderedDict

import numpy as np
import jax
import jax.numpy as jnp
from jax.experimental import pallas as pl
from jax.experimental.pallas import tpu as pltpu


def _round_up(x, m):
    return ((x + m - 1) // m) * m


def _vmem_specs(n):
    return [pl.BlockSpec(memory_space=pltpu.MemorySpace.VMEM) for _ in range(n)]


# ----------------------------------------------------------------------------
# Kernel 1: all FCBlock hypernetworks fused (block-diagonal packing) + bias add
# ----------------------------------------------------------------------------

def hyper_fused_kernel(z_ref, w0_ref, b0_ref, w1_ref, b1_ref, w2_ref, b2_ref,
                       badd_ref, out_ref):
    # Linear -> ReLU -> Linear -> ReLU -> Linear for ALL names at once.
    h = jnp.dot(z_ref[...], w0_ref[...], preferred_element_type=jnp.float32) + b0_ref[...]
    h = jnp.maximum(h, 0.0)
    h = jnp.dot(h, w1_ref[...], preferred_element_type=jnp.float32) + b1_ref[...]
    h = jnp.maximum(h, 0.0)
    lr = jnp.dot(h, w2_ref[...], preferred_element_type=jnp.float32) + b2_ref[...]
    # badd holds the hypo biases at the bias-parameter columns (zeros elsewhere),
    # so bias params leave this kernel fully finished.  Lane-dense 128k output.
    out_ref[...] = (lr + badd_ref[...]).astype(out_ref.dtype)


# ----------------------------------------------------------------------------
# Kernel 2: all low-rank weight products fused: out_i = hypo_w_i * (a_i @ b_i)
# ----------------------------------------------------------------------------

def _make_lowrank_kernel(n):
    def kernel(*refs):
        ins, outs = refs[:3 * n], refs[3 * n:]
        for i in range(n):  # n is tiny & static -> unrolled
            a = ins[3 * i][...]        # (batch, p0_pad, rank)
            b = ins[3 * i + 1][...]    # (batch, rank, p1_pad)  (lane-padded)
            w = ins[3 * i + 2][...]    # (1, p0_pad, p1_pad)    (zero-padded hypo weight)
            lw = jnp.einsum('bpr,brq->bpq', a, b,
                            preferred_element_type=jnp.float32)
            outs[i][...] = (w * lw).astype(outs[i].dtype)
    return kernel


# ----------------------------------------------------------------------------
# LowRankHyperNetwork (JAX/Pallas port)
# ----------------------------------------------------------------------------

def _init_linear(key, in_f, out_f):
    # matches PyTorch nn.Linear default init bounds: U(-1/sqrt(fan_in), 1/sqrt(fan_in))
    kw, kb = jax.random.split(key)
    bound = 1.0 / math.sqrt(in_f)
    w = jax.random.uniform(kw, (out_f, in_f), jnp.float32, -bound, bound)
    b = jax.random.uniform(kb, (out_f,), jnp.float32, -bound, bound)
    return w, b


class LowRankHyperNetworkPallas:
    def __init__(self, hyper_in_features, hyper_hidden_layers, hyper_hidden_features,
                 hypo_parameters, rank=10, key=None):
        assert hyper_hidden_layers == 1, "kernel implements exactly one hidden layer"
        if key is None:
            key = jax.random.PRNGKey(0)
        self.rank = rank
        self.hypo_parameters = hypo_parameters  # OrderedDict[name] -> jnp array
        H = hyper_hidden_features
        self.hidden = H
        self.names = []
        self.param_shapes = []
        self.widths = []
        self.nets = []  # per-name (pre-transposed) weights, kept for the pure-JAX reference

        keys = jax.random.split(key, len(hypo_parameters))
        for (name, param), k in zip(hypo_parameters.items(), keys):
            self.names.append(name)
            shape = tuple(param.shape)
            self.param_shapes.append(shape)
            if 'bias' in name:
                out_features = int(np.prod(shape))
            else:
                out_features = shape[0] * rank + shape[1] * rank
            self.widths.append(out_features)
            k0, k1, k2 = jax.random.split(k, 3)
            w0, b0 = _init_linear(k0, hyper_in_features, H)
            w1, b1 = _init_linear(k1, H, H)
            w2, b2 = _init_linear(k2, H, out_features)
            # init tweaks from LowRankHyperNetwork.__init__
            w2 = w2 * 0.1
            if 'bias' in name:
                b2 = jnp.zeros_like(b2)
            else:
                b2 = jnp.ones_like(b2) / math.sqrt(rank)
            # pre-transpose weights to (in, out), biases to (1, out)
            self.nets.append(dict(w0=w0.T, b0=b0[None, :],
                                  w1=w1.T, b1=b1[None, :],
                                  w2=w2.T, b2=b2[None, :]))

        # ---- pack once: block-diagonal / concatenated weights for the fused kernel ----
        N = len(self.names)
        self.offsets = [int(x) for x in np.cumsum([0] + self.widths[:-1])]
        total = int(sum(self.widths))
        self.total = total
        self.total_pad = _round_up(total, 128)   # lane-dense output slab

        in_f = hyper_in_features
        W0 = np.zeros((in_f, N * H), np.float32)
        B0 = np.zeros((1, N * H), np.float32)
        W1 = np.zeros((N * H, N * H), np.float32)
        B1 = np.zeros((1, N * H), np.float32)
        W2 = np.zeros((N * H, self.total_pad), np.float32)
        B2 = np.zeros((1, self.total_pad), np.float32)
        BADD = np.zeros((1, self.total_pad), np.float32)  # hypo biases, folded in-kernel
        for i, (name, net, off, width) in enumerate(
                zip(self.names, self.nets, self.offsets, self.widths)):
            W0[:, i * H:(i + 1) * H] = np.asarray(net['w0'])
            B0[0, i * H:(i + 1) * H] = np.asarray(net['b0'])[0]
            W1[i * H:(i + 1) * H, i * H:(i + 1) * H] = np.asarray(net['w1'])
            B1[0, i * H:(i + 1) * H] = np.asarray(net['b1'])[0]
            W2[i * H:(i + 1) * H, off:off + width] = np.asarray(net['w2'])
            B2[0, off:off + width] = np.asarray(net['b2'])[0]
            if 'bias' in name:
                BADD[0, off:off + width] = np.asarray(hypo_parameters[name]).reshape(-1)
        self.W0 = jnp.asarray(W0); self.B0 = jnp.asarray(B0)
        self.W1 = jnp.asarray(W1); self.B1 = jnp.asarray(B1)
        self.W2 = jnp.asarray(W2); self.B2 = jnp.asarray(B2)
        self.BADD = jnp.asarray(BADD)

        # lane/sublane-padded hypo weights for the fused low-rank kernel
        self.padded_hypo_w = {}
        self.weight_pads = {}
        for name, shape in zip(self.names, self.param_shapes):
            if 'bias' in name:
                continue
            p0, p1 = shape
            p0_pad, p1_pad = _round_up(p0, 8), _round_up(p1, 128)
            wpad = np.zeros((1, p0_pad, p1_pad), np.float32)
            wpad[0, :p0, :p1] = np.asarray(hypo_parameters[name])
            self.padded_hypo_w[name] = jnp.asarray(wpad)
            self.weight_pads[name] = (p0_pad, p1_pad)

    # ---------------- Pallas forward ----------------
    def forward(self, z):
        batch = z.shape[0]
        # Kernel 1: every per-name FCBlock at once + finished bias params.
        slab = pl.pallas_call(
            hyper_fused_kernel,
            out_shape=jax.ShapeDtypeStruct((batch, self.total_pad), jnp.float32),
            in_specs=_vmem_specs(8),
            out_specs=pl.BlockSpec(memory_space=pltpu.MemorySpace.VMEM),
        )(z, self.W0, self.B0, self.W1, self.B1, self.W2, self.B2, self.BADD)

        params = OrderedDict()
        lowrank_in = []
        weight_meta = []
        for name, shape, off, width in zip(self.names, self.param_shapes,
                                           self.offsets, self.widths):
            if 'bias' in name:
                # hypo bias was already folded in inside kernel 1
                params[name] = slab[:, off:off + width].reshape((batch,) + shape)
            else:
                p0, p1 = shape
                p0_pad, p1_pad = self.weight_pads[name]
                a = slab[:, off:off + self.rank * p0].reshape(batch, p0, self.rank)
                b = slab[:, off + self.rank * p0: off + width].reshape(batch, self.rank, p1)
                # wrapper-side zero padding (free layout plumbing) -> lane-dense stores
                a = jnp.pad(a, ((0, 0), (0, p0_pad - p0), (0, 0)))
                b = jnp.pad(b, ((0, 0), (0, 0), (0, p1_pad - p1)))
                lowrank_in.extend([a, b, self.padded_hypo_w[name]])
                weight_meta.append((name, p0, p1, p0_pad, p1_pad))
                params[name] = None  # placeholder keeps OrderedDict ordering

        if weight_meta:
            n = len(weight_meta)
            out_shape = tuple(jax.ShapeDtypeStruct((batch, p0p, p1p), jnp.float32)
                              for (_, _, _, p0p, p1p) in weight_meta)
            outs = pl.pallas_call(
                _make_lowrank_kernel(n),
                out_shape=out_shape,
                in_specs=_vmem_specs(3 * n),
                out_specs=tuple(pl.BlockSpec(memory_space=pltpu.MemorySpace.VMEM)
                                for _ in range(n)),
            )(*lowrank_in)
            if not isinstance(outs, (tuple, list)):
                outs = (outs,)
            for (name, p0, p1, _, _), o in zip(weight_meta, outs):
                params[name] = o[:, :p0, :p1]
        return params

    # ---------------- pure-JAX reference (no Pallas) for validation ----------------
    def forward_ref(self, z):
        params = OrderedDict()
        for name, shape, net in zip(self.names, self.param_shapes, self.nets):
            h = jnp.maximum(z @ net['w0'] + net['b0'], 0.0)
            h = jnp.maximum(h @ net['w1'] + net['b1'], 0.0)
            lr = h @ net['w2'] + net['b2']
            hypo_p = self.hypo_parameters[name]
            if 'bias' in name:
                params[name] = hypo_p + lr.reshape((-1,) + shape)
            else:
                p0, p1 = shape
                a = lr[:, :self.rank * p0].reshape(-1, p0, self.rank)
                b = lr[:, self.rank * p0:].reshape(-1, self.rank, p1)
                params[name] = hypo_p * jnp.matmul(a, b)
        return params


# ----------------------------------------------------------------------------
# Main
# ----------------------------------------------------------------------------

if __name__ == "__main__":
    key = jax.random.PRNGKey(0)
    k_hypo, k_net, k_z = jax.random.split(key, 3)

    # Synthetic hypo-module: a tiny 2-layer MLP (8 -> 16 -> 4)
    kh = jax.random.split(k_hypo, 4)
    hypo_parameters = OrderedDict([
        ("net.0.weight", 0.1 * jax.random.normal(kh[0], (16, 8), jnp.float32)),
        ("net.0.bias",   0.1 * jax.random.normal(kh[1], (16,), jnp.float32)),
        ("net.2.weight", 0.1 * jax.random.normal(kh[2], (4, 16), jnp.float32)),
        ("net.2.bias",   0.1 * jax.random.normal(kh[3], (4,), jnp.float32)),
    ])

    hyper_in_features = 32
    hyper_hidden_features = 32
    hyper_hidden_layers = 1
    rank = 10
    batch = 2

    hnet = LowRankHyperNetworkPallas(
        hyper_in_features, hyper_hidden_layers, hyper_hidden_features,
        hypo_parameters, rank=rank, key=k_net)

    z = jax.random.normal(k_z, (batch, hyper_in_features), jnp.float32)

    out = hnet.forward(z)
    out = jax.tree_util.tree_map(jax.block_until_ready, out)

    ref = hnet.forward_ref(z)
    for name in ref:
        assert out[name].shape == ref[name].shape, name
        np.testing.assert_allclose(np.asarray(out[name]), np.asarray(ref[name]),
                                   rtol=1e-4, atol=1e-5)

    print("KERNEL_OK")
</pallas_src>

<mosaic_0001>
module attributes {stable_mosaic.version = 11 : i64} {
  func.func @hyper_fused_kernel(%arg0: memref<2x32xf32, #tpu.memory_space<vmem>>, %arg1: memref<32x128xf32, #tpu.memory_space<vmem>>, %arg2: memref<1x128xf32, #tpu.memory_space<vmem>>, %arg3: memref<128x128xf32, #tpu.memory_space<vmem>>, %arg4: memref<1x128xf32, #tpu.memory_space<vmem>>, %arg5: memref<128x512xf32, #tpu.memory_space<vmem>>, %arg6: memref<1x512xf32, #tpu.memory_space<vmem>>, %arg7: memref<1x512xf32, #tpu.memory_space<vmem>>, %arg8: memref<2x512xf32, #tpu.memory_space<vmem>>) attributes {dimension_semantics = [], scalar_prefetch = 0 : i64, scratch_operands = 0 : i64, tpu.core_type = #tpu.core_type<tc>} {
    %c0 = arith.constant 0 : index
    %c0_0 = arith.constant 0 : index
    %0 = vector.load %arg0[%c0, %c0_0] : memref<2x32xf32, #tpu.memory_space<vmem>>, vector<2x32xf32>
    %c0_1 = arith.constant 0 : index
    %c0_2 = arith.constant 0 : index
    %1 = vector.load %arg1[%c0_1, %c0_2] : memref<32x128xf32, #tpu.memory_space<vmem>>, vector<32x128xf32>
    %cst = arith.constant dense<0.000000e+00> : vector<2x128xf32>
    %2 = tpu.matmul %0, %1, %cst {dimension_numbers = #tpu.dot_dimension_numbers<[1], [0], [0], [1], [0, 0, 1, 1], [], []>} : vector<2x32xf32>, vector<32x128xf32>, vector<2x128xf32> -> vector<2x128xf32>
    %c0_3 = arith.constant 0 : index
    %c0_4 = arith.constant 0 : index
    %3 = vector.load %arg2[%c0_3, %c0_4] : memref<1x128xf32, #tpu.memory_space<vmem>>, vector<1x128xf32>
    %4 = vector.broadcast %3 : vector<1x128xf32> to vector<2x128xf32>
    %5 = arith.addf %2, %4 : vector<2x128xf32>
    %cst_5 = arith.constant 0.000000e+00 : f32
    %6 = vector.broadcast %cst_5 : f32 to vector<2x128xf32>
    %7 = arith.maximumf %5, %6 : vector<2x128xf32>
    %c0_6 = arith.constant 0 : index
    %c0_7 = arith.constant 0 : index
    %8 = vector.load %arg3[%c0_6, %c0_7] : memref<128x128xf32, #tpu.memory_space<vmem>>, vector<128x128xf32>
    %cst_8 = arith.constant dense<0.000000e+00> : vector<2x128xf32>
    %9 = tpu.matmul %7, %8, %cst_8 {dimension_numbers = #tpu.dot_dimension_numbers<[1], [0], [0], [1], [0, 0, 1, 1], [], []>} : vector<2x128xf32>, vector<128x128xf32>, vector<2x128xf32> -> vector<2x128xf32>
    %c0_9 = arith.constant 0 : index
    %c0_10 = arith.constant 0 : index
    %10 = vector.load %arg4[%c0_9, %c0_10] : memref<1x128xf32, #tpu.memory_space<vmem>>, vector<1x128xf32>
    %11 = vector.broadcast %10 : vector<1x128xf32> to vector<2x128xf32>
    %12 = arith.addf %9, %11 : vector<2x128xf32>
    %cst_11 = arith.constant 0.000000e+00 : f32
    %13 = vector.broadcast %cst_11 : f32 to vector<2x128xf32>
    %14 = arith.maximumf %12, %13 : vector<2x128xf32>
    %c0_12 = arith.constant 0 : index
    %c0_13 = arith.constant 0 : index
    %15 = vector.load %arg5[%c0_12, %c0_13] : memref<128x512xf32, #tpu.memory_space<vmem>>, vector<128x512xf32>
    %cst_14 = arith.constant dense<0.000000e+00> : vector<2x512xf32>
    %16 = tpu.matmul %14, %15, %cst_14 {dimension_numbers = #tpu.dot_dimension_numbers<[1], [0], [0], [1], [0, 0, 1, 1], [], []>} : vector<2x128xf32>, vector<128x512xf32>, vector<2x512xf32> -> vector<2x512xf32>
    %c0_15 = arith.constant 0 : index
    %c0_16 = arith.constant 0 : index
    %17 = vector.load %arg6[%c0_15, %c0_16] : memref<1x512xf32, #tpu.memory_space<vmem>>, vector<1x512xf32>
    %18 = vector.broadcast %17 : vector<1x512xf32> to vector<2x512xf32>
    %19 = arith.addf %16, %18 : vector<2x512xf32>
    %c0_17 = arith.constant 0 : index
    %c0_18 = arith.constant 0 : index
    %20 = vector.load %arg7[%c0_17, %c0_18] : memref<1x512xf32, #tpu.memory_space<vmem>>, vector<1x512xf32>
    %21 = vector.broadcast %20 : vector<1x512xf32> to vector<2x512xf32>
    %22 = arith.addf %19, %21 : vector<2x512xf32>
    %c0_19 = arith.constant 0 : index
    %c0_20 = arith.constant 0 : index
    %23 = vector.load %arg8[%c0_19, %c0_20] : memref<2x512xf32, #tpu.memory_space<vmem>>, vector<2x512xf32>
    tpu.vector_store %arg8[%c0_19, %c0_20], %22 {strides = array<i32>} : memref<2x512xf32, #tpu.memory_space<vmem>>, vector<2x512xf32>,
    return
  }
}

</mosaic_0001>

<bundles_post_ra>
// kernel: tpu_custom_call.1
= control target key start
LH: loop header
LB: loop body
LE: loop exit
PB: predicated region body
PF: predicated region fallthrough
CT: control target
= control target key end

     0   :  { %13 = vsyncpa [#allocation3], 0  ;;  %s671_s0 = inlined_call_operand.hbm [shape: f32[2,32], index: 0, kind: input, shape index: {}]   ;;  %s672_s1 = inlined_call_operand.hbm [shape: f32[32,128], index: 1, kind: input, shape index: {}]   ;;  %s673_s2 = inlined_call_operand.vmem [shape: f32[1,128], index: 2, kind: input, shape index: {}]   ;;  %s674_s3 = inlined_call_operand.hbm [shape: f32[128,128], index: 3, kind: input, shape index: {}]   ;;  %s675_s4 = inlined_call_operand.hbm [shape: f32[1,128], index: 4, kind: input, shape index: {}]   ;;  %s676_s5 = inlined_call_operand.hbm [shape: f32[128,512], index: 5, kind: input, shape index: {}]   ;;  %s677_s6 = inlined_call_operand.vmem [shape: f32[1,512], index: 6, kind: input, shape index: {}]   ;;  %s678_s7 = inlined_call_operand.hbm [shape: f32[1,512], index: 7, kind: input, shape index: {}]   ;;  %s679_s8 = inlined_call_operand.hbm [shape: f32[2,512], index: 8, kind: output, shape index: {}]  }
   0x1   :  { %14 = vsyncpa [#allocation6], 0 }
   0x2   :  { %15 = vsyncpa [#allocation9], 0 }
   0x3   :  { %16 = vsyncpa [#allocation12], 0  ;;  %s33_s29 = sshll.u32 %s672_s1, 4  ;;  %s34_s29 = int_to_ptr.hbm [resolvable:$true] %s33_s29 }
   0x4   :  { %17 = vsyncpa [#allocation4], 0  ;;  %s588_s30 = smov [#allocation5]   ;;  %s62_s12 = sshll.u32 %s675_s4, 4  ;;  %s63_s12 = int_to_ptr.hbm [resolvable:$true] %s62_s12 }
   0x5   :  { %s35_s9 = sshll.u32 %s588_s30, 4  ;;  %s589_s13 = smov 128   ;;  %s36_s9 = int_to_ptr.vmem [resolvable:$true] %s35_s9 }
   0x6   :  { %s590_s14 = smov 8   ;;  %s591_s15 = smov [#allocation8]  }
   0x7   :  { %41 = dma.hbm_to_vmem [thread:$0]  %s34_s29, 512, %s36_s9, [#allocation6], %s589_s13, %s589_s13, %s590_s14  }
   0x8   :  { %s64_s16 = sshll.u32 %s591_s15, 4  ;;  %s23_s19 = sshll.u32 %s671_s0, 4  ;;  %s65_s16 = int_to_ptr.vmem [resolvable:$true] %s64_s16  ;;  %s24_s19 = int_to_ptr.hbm [resolvable:$true] %s23_s19 }
   0x9   :  { %67 = dma.hbm_to_vmem [thread:$0]  %s63_s12, 16, %s65_s16, [#allocation9]  }
   0xa   :  { %s48_s21 = sshll.u32 %s674_s3, 4  ;;  %s592_s22 = smov [#allocation2]   ;;  %s49_s21 = int_to_ptr.hbm [resolvable:$true] %s48_s21 }
   0xb   :  { %s25_s23 = sshll.u32 %s592_s22, 4  ;;  %s593_s4 = smov [#allocation7]   ;;  %s26_s23 = int_to_ptr.vmem [resolvable:$true] %s25_s23 }
   0xc   :  { %28 = dma.hbm_to_vmem [thread:$0]  %s24_s19, 32, %s26_s23, [#allocation3]  }
   0xd   :  { %s50_s24 = sshll.u32 %s593_s4, 4  ;;  %s72_s27 = sshll.u32 %s676_s5, 4  ;;  %s51_s24 = int_to_ptr.vmem [resolvable:$true] %s50_s24  ;;  %s73_s27 = int_to_ptr.hbm [resolvable:$true] %s72_s27 }
   0xe   :  { %56 = dma.hbm_to_vmem [thread:$0]  %s49_s21, 2048, %s51_s24, [#allocation6], %s589_s13, %s589_s13, %s590_s14  }
   0xf   :  { %s594_s0 = smov [#allocation10]   ;;  %s88_s3 = sshll.u32 %s678_s7, 4  ;;  %s89_s3 = int_to_ptr.hbm [resolvable:$true] %s88_s3 }
  0x10   :  { %s74_s28 = sshll.u32 %s594_s0, 4  ;;  %s595_s9 = smov 512   ;;  %s75_s28 = int_to_ptr.vmem [resolvable:$true] %s74_s28 }
  0x11   :  { %s596_s10 = smov 32   ;;  %s597_s11 = smov [#allocation11]  }
  0x12   :  { %80 = dma.hbm_to_vmem [thread:$0]  %s73_s27, 8192, %s75_s28, [#allocation9], %s595_s9, %s595_s9, %s596_s10  }
  0x13   :  { %s90_s12 = sshll.u32 %s597_s11, 4  ;;  %s91_s12 = int_to_ptr.vmem [resolvable:$true] %s90_s12 }
  0x14   :  { %93 = dma.hbm_to_vmem [thread:$0]  %s89_s3, 64, %s91_s12, [#allocation12]  }
  0x15   :  { %578 = dma.done.wait [#allocation3], 32  }
  0x16   :  { %579 = vsyncadd [#allocation3], 4294967264 }
  0x17   :  { %580 = dma.done.wait [#allocation6], 2560  }
  0x18   :  { %581 = vsyncadd [#allocation6], 4294964736 }
  0x19   :  { %582 = dma.done.wait [#allocation9], 8208  }
  0x1a   :  { %583 = vsyncadd [#allocation9], 4294959088 }
  0x1b   :  { %584 = dma.done.wait [#allocation12], 64  }
  0x1c   :  { %585 = vsyncadd [#allocation12], 4294967232  ;;  %v122_v0 = vld [vmem:[#allocation5 + $0x18] sm:$0xff]  ;;  %v121_v1 = vld [vmem:[#allocation5 + $0x10] sm:$0xff]  ;;  %vm127_vm0 = vcmask 261120   ;;  %vm368_vm1 = vcmask 1041408  }
  0x1d   :  { %143 = vmatpush.msra.mxu0 %v122_v0  ;;  %v167_v2 = vld [vmem:[#allocation7 + $0x78] sm:$0xff]  ;;  %v120_v3 = vld [vmem:[#allocation5 + $0x8] sm:$0xff]  ;;  %v166_v4 = vld [vmem:[#allocation7 + $0x70] sm:$0xff]  ;;  %vm370_vm2 = vcmask 1045508   ;;  %s383_s17 = sshll.u32 %s679_s8, 4  ;;  %vm372_vm3 = vcmask 1043456   ;;  %s384_s17 = int_to_ptr.hbm [resolvable:$true] %s383_s17 }
  0x1e   :  { %172 = vmatpush.msra.mxu1 %v167_v2  ;;  %v165_v5 = vld [vmem:[#allocation7 + $0x68] sm:$0xff]  ;;  %v119_v6 = vld [vmem:[#allocation5] sm:$0xff]  ;;  %v118_v7 = vld [vmem:[#allocation2] sm:$0x3] }
  0x1f   :  { %144 = vmatpush.msra.mxu0 %v121_v1  ;;  %v164_v8 = vld [vmem:[#allocation7 + $0x60] sm:$0xff]  ;;  %v163_v9 = vld [vmem:[#allocation7 + $0x58] sm:$0xff]  ;;  %v162_v10 = vld [vmem:[#allocation7 + $0x50] sm:$0xff] }
  0x20   :  { %173 = vmatpush.msra.mxu1 %v166_v4  ;;  %v161_v11 = vld [vmem:[#allocation7 + $0x48] sm:$0xff]  ;;  %v160_v12 = vld [vmem:[#allocation7 + $0x40] sm:$0xff]  ;;  %v159_v13 = vld [vmem:[#allocation7 + $0x38] sm:$0xff] }
  0x21   :  { %145 = vmatpush.msra.mxu0 %v120_v3  ;;  %v158_v14 = vld [vmem:[#allocation7 + $0x30] sm:$0xff]  ;;  %v157_v15 = vld [vmem:[#allocation7 + $0x28] sm:$0xff]  ;;  %v156_v16 = vld [vmem:[#allocation7 + $0x20] sm:$0xff] }
  0x22   :  { %174 = vmatpush.msra.mxu1 %v165_v5  ;;  %v155_v17 = vld [vmem:[#allocation7 + $0x18] sm:$0xff]  ;;  %v154_v18 = vld [vmem:[#allocation7 + $0x10] sm:$0xff]  ;;  %v153_v19 = vld [vmem:[#allocation7 + $0x8] sm:$0xff] }
  0x23   :  { %146 = vmatpush.msra.mxu0 %v119_v6  ;;  %v152_v20 = vld [vmem:[#allocation7] sm:$0xff]  ;;  %v254_v22 = vld [vmem:[#allocation10 + $0x1e8] sm:$0xff]  ;;  %v255_v23 = vld [vmem:[#allocation10 + $0x1f0] sm:$0xff] }
  0x24   :  { %396 = vmatmul.msk.f32.vlgmr.msra.gmra.mxu0 %vm127_vm0, %v118_v7  ;;  %175 = vmatpush.msra.mxu1 %v164_v8  ;;  %v253_v21 = vld [vmem:[#allocation10 + $0x1e0] sm:$0xff]  ;;  %v256_v24 = vld [vmem:[#allocation10 + $0x1f8] sm:$0xff]  ;;  %v250_v26 = vld [vmem:[#allocation10 + $0x1c8] sm:$0xff] }
  0x25   :  { %267 = vmatpush.msra.mxu2 %v253_v21  ;;  %287 = vmatpush.msra.mxu3 %v254_v22  ;;  %v249_v25 = vld [vmem:[#allocation10 + $0x1c0] sm:$0xff]  ;;  %v251_v27 = vld [vmem:[#allocation10 + $0x1d0] sm:$0xff]  ;;  %v252_v28 = vld [vmem:[#allocation10 + $0x1d8] sm:$0xff] }
  0x26   :  { %176 = vmatpush.msra.mxu1 %v163_v9  ;;  %307 = vmatpush.msrb.mxu0 %v255_v23  ;;  %v245_v29 = vld [vmem:[#allocation10 + $0x1a0] sm:$0xff]  ;;  %v246_v30 = vld [vmem:[#allocation10 + $0x1a8] sm:$0xff]  ;;  %v247_v31 = vld [vmem:[#allocation10 + $0x1b0] sm:$0xff] }
  0x27   :  { %268 = vmatpush.msra.mxu2 %v249_v25  ;;  %288 = vmatpush.msra.mxu3 %v250_v26  ;;  %v248_v32 = vld [vmem:[#allocation10 + $0x1b8] sm:$0xff]  ;;  %v241_v33 = vld [vmem:[#allocation10 + $0x180] sm:$0xff]  ;;  %v242_v34 = vld [vmem:[#allocation10 + $0x188] sm:$0xff] }
  0x28   :  { %177 = vmatpush.msra.mxu1 %v162_v10  ;;  %308 = vmatpush.msrb.mxu0 %v251_v27  ;;  %v243_v35 = vld [vmem:[#allocation10 + $0x190] sm:$0xff]  ;;  %v244_v36 = vld [vmem:[#allocation10 + $0x198] sm:$0xff]  ;;  %v237_v37 = vld [vmem:[#allocation10 + $0x160] sm:$0xff] }
  0x29   :  { %269 = vmatpush.msra.mxu2 %v245_v29  ;;  %289 = vmatpush.msra.mxu3 %v246_v30  ;;  %v238_v38 = vld [vmem:[#allocation10 + $0x168] sm:$0xff]  ;;  %v239_v39 = vld [vmem:[#allocation10 + $0x170] sm:$0xff]  ;;  %v240_v40 = vld [vmem:[#allocation10 + $0x178] sm:$0xff] }
  0x2a   :  { %178 = vmatpush.msra.mxu1 %v161_v11  ;;  %309 = vmatpush.msrb.mxu0 %v247_v31  ;;  %v233_v41 = vld [vmem:[#allocation10 + $0x140] sm:$0xff]  ;;  %v234_v42 = vld [vmem:[#allocation10 + $0x148] sm:$0xff]  ;;  %v235_v43 = vld [vmem:[#allocation10 + $0x150] sm:$0xff] }
  0x2b   :  { %270 = vmatpush.msra.mxu2 %v241_v33  ;;  %290 = vmatpush.msra.mxu3 %v242_v34  ;;  %v236_v44 = vld [vmem:[#allocation10 + $0x158] sm:$0xff]  ;;  %v229_v45 = vld [vmem:[#allocation10 + $0x120] sm:$0xff]  ;;  %v230_v46 = vld [vmem:[#allocation10 + $0x128] sm:$0xff] }
  0x2c   :  { %179 = vmatpush.msra.mxu1 %v160_v12  ;;  %310 = vmatpush.msrb.mxu0 %v243_v35  ;;  %v231_v47 = vld [vmem:[#allocation10 + $0x130] sm:$0xff]  ;;  %v232_v48 = vld [vmem:[#allocation10 + $0x138] sm:$0xff]  ;;  %v225_v49 = vld [vmem:[#allocation10 + $0x100] sm:$0xff] }
  0x2d   :  { %271 = vmatpush.msra.mxu2 %v237_v37  ;;  %291 = vmatpush.msra.mxu3 %v238_v38  ;;  %v226_v50 = vld [vmem:[#allocation10 + $0x108] sm:$0xff]  ;;  %v227_v51 = vld [vmem:[#allocation10 + $0x110] sm:$0xff]  ;;  %v228_v52 = vld [vmem:[#allocation10 + $0x118] sm:$0xff] }
  0x2e   :  { %180 = vmatpush.msra.mxu1 %v159_v13  ;;  %311 = vmatpush.msrb.mxu0 %v239_v39  ;;  %v221_v53 = vld [vmem:[#allocation10 + $0xe0] sm:$0xff]  ;;  %v222_v54 = vld [vmem:[#allocation10 + $0xe8] sm:$0xff]  ;;  %v223_v55 = vld [vmem:[#allocation10 + $0xf0] sm:$0xff] }
  0x2f   :  { %272 = vmatpush.msra.mxu2 %v233_v41  ;;  %292 = vmatpush.msra.mxu3 %v234_v42  ;;  %v224_v56 = vld [vmem:[#allocation10 + $0xf8] sm:$0xff]  ;;  %v217_v57 = vld [vmem:[#allocation10 + $0xc0] sm:$0xff]  ;;  %v218_v58 = vld [vmem:[#allocation10 + $0xc8] sm:$0xff] }
  0x30   :  { %181 = vmatpush.msra.mxu1 %v158_v14  ;;  %312 = vmatpush.msrb.mxu0 %v235_v43  ;;  %v219_v59 = vld [vmem:[#allocation10 + $0xd0] sm:$0xff]  ;;  %v220_v60 = vld [vmem:[#allocation10 + $0xd8] sm:$0xff]  ;;  %v213_v61 = vld [vmem:[#allocation10 + $0xa0] sm:$0xff] }
  0x31   :  { %273 = vmatpush.msra.mxu2 %v229_v45  ;;  %293 = vmatpush.msra.mxu3 %v230_v46  ;;  %v214_v62 = vld [vmem:[#allocation10 + $0xa8] sm:$0xff]  ;;  %v215_v63 = vld [vmem:[#allocation10 + $0xb0] sm:$0xff]  ;;  %v216_v0 = vld [vmem:[#allocation10 + $0xb8] sm:$0xff] }
  0x32   :  { %182 = vmatpush.msra.mxu1 %v157_v15  ;;  %313 = vmatpush.msrb.mxu0 %v231_v47  ;;  %v209_v1 = vld [vmem:[#allocation10 + $0x80] sm:$0xff]  ;;  %v210_v2 = vld [vmem:[#allocation10 + $0x88] sm:$0xff]  ;;  %v211_v3 = vld [vmem:[#allocation10 + $0x90] sm:$0xff] }
  0x33   :  { %274 = vmatpush.msra.mxu2 %v225_v49  ;;  %294 = vmatpush.msra.mxu3 %v226_v50  ;;  %v212_v4 = vld [vmem:[#allocation10 + $0x98] sm:$0xff]  ;;  %v205_v5 = vld [vmem:[#allocation10 + $0x60] sm:$0xff]  ;;  %v206_v6 = vld [vmem:[#allocation10 + $0x68] sm:$0xff] }
  0x34   :  { %183 = vmatpush.msra.mxu1 %v156_v16  ;;  %314 = vmatpush.msrb.mxu0 %v227_v51  ;;  %v207_v7 = vld [vmem:[#allocation10 + $0x70] sm:$0xff]  ;;  %v208_v8 = vld [vmem:[#allocation10 + $0x78] sm:$0xff]  ;;  %v201_v13 = vld [vmem:[#allocation10 + $0x40] sm:$0xff] }
  0x35   :  { %275 = vmatpush.msra.mxu2 %v221_v53  ;;  %295 = vmatpush.msra.mxu3 %v222_v54  ;;  %v408_v9 = vld [vmem:[%s673_s2] ss:$0 sm:$0xff]  ;;  %v202_v14 = vld [vmem:[#allocation10 + $0x48] sm:$0xff]  ;;  %v203_v15 = vld [vmem:[#allocation10 + $0x50] sm:$0xff] }
  0x36   :  { %184 = vmatpush.msra.mxu1 %v155_v17  ;;  %315 = vmatpush.msrb.mxu0 %v223_v55  ;;  %v204_v16 = vld [vmem:[#allocation10 + $0x58] sm:$0xff]  ;;  %v197_v17 = vld [vmem:[#allocation10 + $0x20] sm:$0xff]  ;;  %v194_v22 = vld [vmem:[#allocation10 + $0x8] sm:$0xff] }
  0x37   :  { %276 = vmatpush.msra.mxu2 %v217_v57  ;;  %296 = vmatpush.msra.mxu3 %v218_v58  ;;  %v193_v21 = vld [vmem:[#allocation10] sm:$0xff]  ;;  %v195_v23 = vld [vmem:[#allocation10 + $0x10] sm:$0xff]  ;;  %v409_v25 = vld [vmem:[#allocation8] ss:$0 sm:$0xff] }
  0x38   :  { %185 = vmatpush.msra.mxu1 %v154_v18  ;;  %316 = vmatpush.msrb.mxu0 %v219_v59  ;;  %v198_v18 = vld [vmem:[#allocation10 + $0x28] sm:$0xff]  ;;  %v257_v29 = vld [vmem:[%s677_s6] sm:$0xf]  ;;  %v347_v31 = vld [vmem:[#allocation11] sm:$0xf]  ;;  %s598_s6 = smov [#allocation13]  }
  0x39   :  { %277 = vmatpush.msra.mxu2 %v213_v61  ;;  %297 = vmatpush.msra.mxu3 %v214_v62  ;;  %v261_v30 = vperm.slane %v257_v29, 2  ;;  %v351_v34 = vperm.slane %v347_v31, 2  ;;  %v259_v39 = vperm.slane %v257_v29, 0  ;;  %v350_v43 = vperm.slane %v347_v31, 1  ;;  %s381_s14 = sshll.u32 %s598_s6, 4  ;;  %s382_s14 = int_to_ptr.vmem [resolvable:$true] %s381_s14 }
  0x3a   :  { %186 = vmatpush.msra.mxu1 %v153_v19  ;;  %317 = vmatpush.msrb.mxu0 %v215_v63  ;;  %v199_v19 = vld [vmem:[#allocation10 + $0x30] sm:$0xff]  ;;  %v349_v47 = vperm.slane %v347_v31, 0 }
  0x3b   :  { %278 = vmatpush.msra.mxu2 %v209_v1  ;;  %298 = vmatpush.msra.mxu3 %v210_v2 }
  0x3c   :  { %187 = vmatpush.msra.mxu1 %v152_v20  ;;  %318 = vmatpush.msrb.mxu0 %v211_v3  ;;  %v200_v20 = vld [vmem:[#allocation10 + $0x38] sm:$0xff] }
  0x3d   :  { %279 = vmatpush.msra.mxu2 %v205_v5  ;;  %299 = vmatpush.msra.mxu3 %v206_v6 }
  0x3e   :  { %327 = vmatpush.msrb.mxu1 %v256_v24  ;;  %319 = vmatpush.msrb.mxu0 %v207_v7  ;;  %v196_v24 = vld [vmem:[#allocation10 + $0x18] sm:$0xff] }
  0x3f   :  { %280 = vmatpush.msra.mxu2 %v201_v13  ;;  %300 = vmatpush.msra.mxu3 %v202_v14 }
  0x40   :  { %328 = vmatpush.msrb.mxu1 %v252_v28  ;;  %320 = vmatpush.msrb.mxu0 %v203_v15 }
  0x41   :  { %281 = vmatpush.msra.mxu2 %v197_v17  ;;  %301 = vmatpush.msra.mxu3 %v198_v18 }
  0x42   :  { %329 = vmatpush.msrb.mxu1 %v248_v32  ;;  %321 = vmatpush.msrb.mxu0 %v199_v19  ;;  %v262_v32 = vperm.slane %v257_v29, 3 }
  0x43   :  { %282 = vmatpush.msra.mxu2 %v193_v21  ;;  %302 = vmatpush.msra.mxu3 %v194_v22 }
  0x44   :  { %330 = vmatpush.msrb.mxu1 %v244_v36  ;;  %322 = vmatpush.msrb.mxu0 %v195_v23  ;;  %v352_v36 = vperm.slane %v347_v31, 3 }
  0x46   :  { %331 = vmatpush.msrb.mxu1 %v240_v40  ;;  %v260_v40 = vperm.slane %v257_v29, 1 }
  0x48   :  { %332 = vmatpush.msrb.mxu1 %v236_v44 }
  0x4a   :  { %333 = vmatpush.msrb.mxu1 %v232_v48 }
  0x4c   :  { %334 = vmatpush.msrb.mxu1 %v228_v52 }
  0x4e   :  { %335 = vmatpush.msrb.mxu1 %v224_v56 }
  0x50   :  { %336 = vmatpush.msrb.mxu1 %v220_v60 }
  0x52   :  { %337 = vmatpush.msrb.mxu1 %v216_v0 }
  0x54   :  { %338 = vmatpush.msrb.mxu1 %v212_v4 }
  0x56   :  { %339 = vmatpush.msrb.mxu1 %v208_v8 }
  0x58   :  { %340 = vmatpush.msrb.mxu1 %v204_v16 }
  0x5a   :  { %341 = vmatpush.msrb.mxu1 %v200_v20 }
  0x5c   :  { %342 = vmatpush.msrb.mxu1 %v196_v24 }
  0xa1   :  { %v148_v10 = vpop.f32.mrf.mxu0 }
  0xa2   :  { %v149_v11 = vadd.f32 %v408_v9, %v148_v10 }
  0xa4   :  { %v151_v12 = vmax.f32 %v149_v11, 0.0 }
  0xa6   :  { %188 = vmatmul.f32.vlgmr.msra.gmra.mxu1 %v151_v12 }
 0x123   :  { %v189_v26 = vpop.f32.mrf.mxu1 }
 0x124   :  { %v190_v27 = vadd.f32 %v409_v25, %v189_v26 }
 0x126   :  { %v192_v28 = vmax.f32 %v190_v27, 0.0 }
 0x128   :  { %283 = vmatmul.f32.vlgmr.msra.gmra.mxu2 %v192_v28  ;;  %303 = vmatmul.f32.vlgmr.msra.gmra.mxu3 %v192_v28 }
 0x129   :  { %323 = vmatmul.f32.vlgmr.msrb.gmra.mxu0 %v192_v28  ;;  %343 = vmatmul.f32.vlgmr.msrb.gmra.mxu1 %v192_v28 }
 0x1a6   :  { %v324_v33 = vpop.f32.mrf.mxu0  ;;  %v344_v35 = vpop.f32.mrf.mxu1 }
 0x1a7   :  { %v325_v37 = vadd.f32 %v324_v33, %v261_v30  ;;  %v345_v38 = vadd.f32 %v344_v35, %v262_v32 }
 0x1a9   :  { %v359_v41 = vadd.f32 %v351_v34, %v325_v37  ;;  %v360_v42 = vadd.f32 %v352_v36, %v345_v38 }
 0x1ab   :  { %v284_v44 = vpop.f32.mrf.mxu2  ;;  %v304_v45 = vpop.f32.mrf.mxu3  ;;  %v366_v49 = vrot.slane %v359_v41, 4  ;;  %v367_v50 = vrot.slane %v360_v42, 2 }
 0x1ac   :  { %v285_v46 = vadd.f32 %v284_v44, %v259_v39  ;;  %v305_v48 = vadd.f32 %v304_v45, %v260_v40 }
 0x1ad   :  { %v371_v55 = vsel %vm370_vm2, %v366_v49, %v367_v50 }
 0x1ae   :  { %v358_v51 = vadd.f32 %v350_v43, %v305_v48  ;;  %v357_v52 = vadd.f32 %v349_v47, %v285_v46 }
 0x1b0   :  { %v365_v53 = vrot.slane %v358_v51, 6 }
 0x1b2   :  { %v369_v54 = vsel %vm368_vm1, %v357_v52, %v365_v53 }
 0x1b3   :  { %v373_v56 = vsel %vm372_vm3, %v369_v54, %v371_v55 }
 0x1b4   :  { %375 = vst [vmem:[#allocation13] sm:$0xff] %v373_v56 }
 0x1b5   :  { %386 = dma.vmem_to_hbm [thread:$0]  %s382_s14, 128, %s384_s17, [#allocation4]  }
 0x1b6   :  { %586 = dma.done.wait [#allocation4], 128  }
 0x1b7   :  { %587 = vsyncadd [#allocation4], 4294967168 }
 0x1b8   :  { %391 = vsyncpa [#allocation3], 1 }
 0x1b9   :  { %392 = vsyncpa [#allocation6], 1 }
 0x1ba   :  { %393 = vsyncpa [#allocation9], 1 }
 0x1bb   :  { %394 = vsyncpa [#allocation12], 1 }
 0x1bc   :  { %395 = vsyncpa [#allocation4], 1 }

</bundles_post_ra>
